<compile_context>
chip_gen: v6e
topology: v6e:2x2x1
jax: 0.10.0
libtpu: 0.0.40
codegen_flags: <defaults>
</compile_context>

<pallas_src>
import jax
import jax.numpy as jnp
from jax.experimental import pallas as pl
from jax.experimental.pallas import tpu as pltpu


def _mlp_kernel(x_ref, w_ref, b_ref, o_ref):
    # x_ref: [tm, H_in]   w_ref: [H_in, tn] (pre-transposed)   b_ref: [1, tn]
    # o_ref: [tm, tn]
    x = x_ref[...]
    w = w_ref[...]
    if x.dtype != w.dtype:            # trace-time check; no-op when caller passes bf16
        x = x.astype(w.dtype)
    # Plain x @ w on the MXU (weight already [K, N]); f32 accumulation.
    y = jnp.dot(x, w, preferred_element_type=jnp.float32)
    y = y + b_ref[...]                              # bias add in f32 (VPU)
    o_ref[...] = jnp.tanh(y).astype(o_ref.dtype)    # tanh in f32 (EUP), cast at store


def _pick_lane_tile(dim, preferred):
    """Largest multiple-of-128 tile <= preferred dividing `dim`, else full dim.

    Never returns a non-128-multiple partial tile (avoids masked vst.msk stores).
    """
    if dim <= preferred:
        return dim
    cand = (preferred // 128) * 128
    while cand >= 128:
        if dim % cand == 0:
            return cand
        cand -= 128
    return dim


def _device_vmem_bytes():
    try:
        return int(pltpu.get_tpu_info().vmem_capacity_bytes)
    except Exception:
        return 64 << 20   # v7x per-TC capacity; safe lower bound on all generations


def init_mlp_params(weight, bias, *, param_dtype=jnp.bfloat16):
    """One-time parameter prep: cast weight to bf16 and transpose to [H_in, H_out].

    Doing the transpose (and cast) once at init keeps the per-call kernel free of
    in-kernel XLU transposes and halves weight HBM traffic.
    """
    w_t = jnp.asarray(weight, dtype=param_dtype).T            # [H_in, H_out]
    b2 = jnp.asarray(bias, dtype=jnp.float32).reshape(1, -1)  # [1, H_out], f32
    return w_t, b2


def mlp_layer(features, w_t, b2, *, tile_m=512, out_dtype=None):
    """SimCSE MLPLayer forward: tanh(features @ W^T + b).

    features: [B, H_in]          (pass bf16 in a bf16 model to halve HBM traffic)
    w_t:      [H_in, H_out]      (pre-transposed / pre-cast via init_mlp_params)
    b2:       [1, H_out] float32
    """
    B, H_in = features.shape
    H_in_w, H_out = w_t.shape
    assert H_in_w == H_in and b2.shape == (1, H_out)
    out_dtype = features.dtype if out_dtype is None else out_dtype

    w_itemsize = jnp.dtype(w_t.dtype).itemsize
    x_itemsize = jnp.dtype(features.dtype).itemsize
    o_itemsize = jnp.dtype(out_dtype).itemsize
    vmem_cap = _device_vmem_bytes()

    # --- M tiling ---------------------------------------------------------
    tm = B if B <= tile_m else tile_m
    m_tiles = pl.cdiv(B, tm)

    # --- N tiling: keep the whole weight resident when it fits -------------
    full_w_bytes = H_in * H_out * w_itemsize
    if full_w_bytes <= vmem_cap // 4:
        tn = H_out                      # weight resident: DMA'd once per call
    else:
        tn = _pick_lane_tile(H_out, 2048)

    # v7x: guarantee >= 2 grid steps so both TensorCores get work when the
    # batch fits in a single M tile (near-free on single-TC v5e/v6e).
    if m_tiles == 1 and tn == H_out and H_out % 256 == 0:
        tn = H_out // 2
    n_tiles = pl.cdiv(H_out, tn)

    # Shrink the M tile if the double-buffered footprint would overflow VMEM
    # (only relevant for very large H_in models).
    def _needed(tm_):
        x_b = tm_ * H_in * x_itemsize
        o_b = tm_ * tn * o_itemsize
        w_b = H_in * tn * w_itemsize
        b_b = tn * 4
        return 2 * (x_b + o_b + b_b + w_b) + (4 << 20)

    while tm > 128 and _needed(tm) > vmem_cap:
        tm = max(128, tm // 2)
        m_tiles = pl.cdiv(B, tm)
    vmem_limit = int(min(max(_needed(tm), 16 << 20), vmem_cap))

    # Grid: N outer, M inner -> weight/bias block indices are constant across
    # the inner M loop, so each weight slab is streamed from HBM exactly once.
    grid = (n_tiles, m_tiles)

    return pl.pallas_call(
        _mlp_kernel,
        out_shape=jax.ShapeDtypeStruct((B, H_out), out_dtype),
        grid_spec=pltpu.PrefetchScalarGridSpec(
            num_scalar_prefetch=0,
            grid=grid,
            in_specs=[
                pl.BlockSpec((tm, H_in), lambda j, i: (i, 0)),   # activation tile
                pl.BlockSpec((H_in, tn), lambda j, i: (0, j)),   # resident weight slab
                pl.BlockSpec((1, tn), lambda j, i: (0, j)),      # bias slab (f32)
            ],
            out_specs=pl.BlockSpec((tm, tn), lambda j, i: (i, j)),
        ),
        compiler_params=pltpu.CompilerParams(
            dimension_semantics=("parallel", "parallel"),
            vmem_limit_bytes=vmem_limit,
        ),
    )(features, w_t, b2)


if __name__ == "__main__":
    key = jax.random.PRNGKey(0)
    k_x, k_w, k_b = jax.random.split(key, 3)

    # Small synthetic config (config.hidden_size = 32). Production hidden sizes
    # (768/1024) are lane-dense multiples of 128; this toy shape is a smoke
    # test (blocks equal full array dims, so layout constraints hold).
    batch, hidden = 8, 32
    features_f32 = jax.random.normal(k_x, (batch, hidden), dtype=jnp.float32)
    weight_f32 = jax.random.normal(k_w, (hidden, hidden), dtype=jnp.float32) * 0.02
    bias = jax.random.normal(k_b, (hidden,), dtype=jnp.float32) * 0.02

    # One-time init: bf16 cast + transpose of the PyTorch-layout weight.
    w_t, b2 = init_mlp_params(weight_f32, bias)
    # bf16 features/output path (what a bf16 model would feed the pooler).
    features = features_f32.astype(jnp.bfloat16)

    out = jax.block_until_ready(mlp_layer(features, w_t, b2))
    assert out.shape == (batch, hidden)
    assert out.dtype == jnp.bfloat16

    # Reference with identical bf16 rounding of matmul inputs, f32 accumulate.
    x_r = features.astype(jnp.float32)
    w_r = w_t.astype(jnp.float32)
    ref = jnp.tanh(x_r @ w_r + bias)
    assert jnp.allclose(out.astype(jnp.float32), ref, atol=2e-2, rtol=2e-2), \
        "mismatch vs bf16-rounded reference"

    # Loose sanity check against the pure-f32 module semantics.
    ref_f32 = jnp.tanh(features_f32 @ weight_f32.T + bias)
    assert jnp.allclose(out.astype(jnp.float32), ref_f32, atol=3e-2, rtol=3e-2), \
        "mismatch vs f32 reference"

    print("KERNEL_OK")
</pallas_src>

<mosaic_0001>
module attributes {stable_mosaic.version = 11 : i64} {
  func.func @_mlp_kernel(%arg0: i32, %arg1: i32, %arg2: memref<8x32xbf16, #tpu.memory_space<vmem>>, %arg3: memref<32x32xbf16, #tpu.memory_space<vmem>>, %arg4: memref<1x32xf32, #tpu.memory_space<vmem>>, %arg5: memref<8x32xbf16, #tpu.memory_space<vmem>>) attributes {dimension_semantics = [#tpu.dimension_semantics<parallel>, #tpu.dimension_semantics<parallel>], iteration_bounds = array<i64: 1, 1>, scalar_prefetch = 0 : i64, scratch_operands = 0 : i64, tpu.core_type = #tpu.core_type<tc>, window_params = [{transform_indices = @transform_0, window_bounds = array<i64: 8, 32>}, {transform_indices = @transform_1, window_bounds = array<i64: 32, 32>}, {transform_indices = @transform_2, window_bounds = array<i64: 1, 32>}, {transform_indices = @transform_3, window_bounds = array<i64: 8, 32>}]} {
    %c0 = arith.constant 0 : index
    %c0_0 = arith.constant 0 : index
    %0 = vector.load %arg2[%c0, %c0_0] : memref<8x32xbf16, #tpu.memory_space<vmem>>, vector<8x32xbf16>
    %c0_1 = arith.constant 0 : index
    %c0_2 = arith.constant 0 : index
    %1 = vector.load %arg3[%c0_1, %c0_2] : memref<32x32xbf16, #tpu.memory_space<vmem>>, vector<32x32xbf16>
    %cst = arith.constant dense<0.000000e+00> : vector<8x32xf32>
    %2 = tpu.matmul %0, %1, %cst {dimension_numbers = #tpu.dot_dimension_numbers<[1], [0], [0], [1], [0, 0, 1, 1], [], []>} : vector<8x32xbf16>, vector<32x32xbf16>, vector<8x32xf32> -> vector<8x32xf32>
    %c0_3 = arith.constant 0 : index
    %c0_4 = arith.constant 0 : index
    %3 = vector.load %arg4[%c0_3, %c0_4] : memref<1x32xf32, #tpu.memory_space<vmem>>, vector<1x32xf32>
    %4 = vector.broadcast %3 : vector<1x32xf32> to vector<8x32xf32>
    %5 = arith.addf %2, %4 : vector<8x32xf32>
    %6 = math.tanh %5 : vector<8x32xf32>
    %7 = arith.truncf %6 : vector<8x32xf32> to vector<8x32xbf16>
    %c0_5 = arith.constant 0 : index
    %c0_6 = arith.constant 0 : index
    %8 = vector.load %arg5[%c0_5, %c0_6] : memref<8x32xbf16, #tpu.memory_space<vmem>>, vector<8x32xbf16>
    tpu.vector_store %arg5[%c0_5, %c0_6], %7 {strides = array<i32>} : memref<8x32xbf16, #tpu.memory_space<vmem>>, vector<8x32xbf16>,
    return
  }
  func.func @transform_0(%arg0: i32, %arg1: i32) -> (i32, i32) {
    %c0_i32 = arith.constant 0 : i32
    %c0_i32_0 = arith.constant 0 : i32
    return %arg1, %c0_i32 : i32, i32
  }
  func.func @transform_1(%arg0: i32, %arg1: i32) -> (i32, i32) {
    %c0_i32 = arith.constant 0 : i32
    %c0_i32_0 = arith.constant 0 : i32
    return %c0_i32, %arg0 : i32, i32
  }
  func.func @transform_2(%arg0: i32, %arg1: i32) -> (i32, i32) {
    %c0_i32 = arith.constant 0 : i32
    %c0_i32_0 = arith.constant 0 : i32
    return %c0_i32, %arg0 : i32, i32
  }
  func.func @transform_3(%arg0: i32, %arg1: i32) -> (i32, i32) {
    %c0_i32 = arith.constant 0 : i32
    return %arg1, %arg0 : i32, i32
  }
}

</mosaic_0001>

<bundles_post_ra>
// kernel: tpu_custom_call.1
= control target key start
LH: loop header
LB: loop body
LE: loop exit
PB: predicated region body
PF: predicated region fallthrough
CT: control target
= control target key end

     0   :  { %8 = vsyncpa [#allocation3], 0  ;;  %s261_s0 = inlined_call_operand.hbm [shape: bf16[8,32], index: 0, kind: input, shape index: {}]   ;;  %s262_s1 = inlined_call_operand.hbm [shape: bf16[32,32], index: 1, kind: input, shape index: {}]   ;;  %s263_s2 = inlined_call_operand.vmem [shape: f32[1,32], index: 2, kind: input, shape index: {}]   ;;  %s264_s3 = inlined_call_operand.hbm [shape: bf16[8,32], index: 3, kind: output, shape index: {}]  }
   0x1   :  { %9 = vsyncpa [#allocation6], 0 }
   0x2   :  { %10 = vsyncpa [#allocation4], 0  ;;  %s222_s12 = smov [#allocation2]   ;;  %s223_s14 = smov [#allocation5]  }
   0x3   :  { %s17_s13 = sshll.u32 %s222_s12, 4  ;;  %s26_s15 = sshll.u32 %s223_s14, 4  ;;  %s18_s13 = int_to_ptr.vmem [resolvable:$true] %s17_s13  ;;  %s27_s15 = int_to_ptr.vmem [resolvable:$true] %s26_s15 }
   0x4   :  { %s164_s16 = scalar_lea.vmem %s18_s13, 64  ;;  %p169_p1 = scmp.lt.s32.totalorder %s18_s13, %s18_s13 }
   0x5   :  { %p165_p0 = scmp.ne.s32.totalorder %s18_s13, %s164_s16  ;;  %p170_p2 = scmp.lt.s32.totalorder %s164_s16, %s164_s16 }
   0x7   :  { %p171_p3 = por %p170_p2, %p169_p1 }
   0x9   :  { %p172_p4 = pnand %p171_p3, %p165_p0 }
   0xb   :  { %175 = shalt.err (!%p172_p4)
}
   0xc   :  { %20 = dma.hbm_to_vmem [thread:$0]  %s261_s0, 64, %s18_s13, [#allocation3]  }
   0xd   :  { %s184_s19 = scalar_lea.vmem %s27_s15, 256  ;;  %p189_p6 = scmp.lt.s32.totalorder %s27_s15, %s27_s15 }
   0xe   :  { %p185_p5 = scmp.ne.s32.totalorder %s27_s15, %s184_s19  ;;  %p190_p7 = scmp.lt.s32.totalorder %s184_s19, %s184_s19 }
  0x10   :  { %p191_p8 = por %p190_p7, %p189_p6 }
  0x12   :  { %p192_p9 = pnand %p191_p8, %p185_p5 }
  0x14   :  { %195 = shalt.err (!%p192_p9)
}
  0x15   :  { %s224_s20 = smov 64   ;;  %s225_s21 = smov 4  }
  0x16   :  { %32 = dma.hbm_to_vmem [thread:$0]  %s262_s1, 256, %s27_s15, [#allocation6], %s224_s20, %s224_s20, %s225_s21  }
  0x17   :  { %216 = dma.done.wait [#allocation3], 64  }
  0x18   :  { %217 = vsyncadd [#allocation3], 4294967232 }
  0x19   :  { %218 = dma.done.wait [#allocation6], 256  }
  0x1a   :  { %219 = vsyncadd [#allocation6], 4294967040  ;;  %v226_v0 = vmov 0.0   ;;  %vm227_vm0 = vmmov 0   ;;  %v152_v1 = vld [vmem:[#allocation5 + $0x8] sm:$0xff]   ;;  %v153_v2 = vld [vmem:[#allocation5] sm:$0xff]  }
  0x1b   :  { %137 = vmatprep.subr.bf16.mxu0 %v226_v0  ;;  %141 = vmatprep.mubr.msk.bf16.mxu0 %vm227_vm0, %v226_v0  ;;  %v42_v3 = vld [vmem:[#allocation2] sm:$0xf]  ;;  %vm66_vm1 = vcmask 261120   ;;  %s228_s1 = smov [#allocation7]   ;;  %vm112_vm2 = vcmask 257024  }
  0x1c   :  { %138 = vmatpush3.bf16.msra.mxu0 %v152_v1  ;;  %v130_v4 = vld [vmem:[%s263_s2] ss:$0 sm:$0xff]  ;;  %s120_s25 = sshll.u32 %s228_s1, 4  ;;  %s121_s25 = int_to_ptr.vmem [resolvable:$true] %s120_s25 }
  0x1d   :  { %139 = vmatprep.subr.bf16.mxu0 %v226_v0  ;;  %s196_s26 = scalar_lea.vmem %s121_s25, 64  ;;  %p201_p11 = scmp.lt.s32.totalorder %s121_s25, %s121_s25 }
  0x1e   :  { %p197_p10 = scmp.ne.s32.totalorder %s121_s25, %s196_s26  ;;  %p202_p12 = scmp.lt.s32.totalorder %s196_s26, %s196_s26 }
  0x20   :  { %140 = vmatpush3.bf16.msra.mxu0 %v153_v2  ;;  %p203_p13 = por %p202_p12, %p201_p11 }
  0x22   :  { %p204_p0 = pnand %p203_p13, %p197_p10 }
  0x23   :  { %142 = vmatmul.mubr.msk.bf16.vlgmr.msra.gmra.mxu0 %vm66_vm1, %v42_v3 }
  0xe3   :  { %v104_v5 = vpop.f32.mrf.mxu0 }
  0xe4   :  { %v105_v6 = vadd.f32 %v130_v4, %v104_v5 }
  0xe5   :  { %v143_v7 = vpop.f32.mrf.mxu0 }
  0xe6   :  { %154 = vtanh.f32 %v105_v6 }
  0xe7   :  { %v107_v8 = vpop.f32.mrf.mxu0 }
  0xe9   :  { %v144_v9 = vpop.f32.mrf.mxu0 }
  0xf3   :  { %v155_v10 = vpop.eup %154 }
  0xf4   :  { %v111_v11 = vpack.c.bf16 %v155_v10, %v155_v10 }
  0xf6   :  { %113 = vst.msk [vmem:[#allocation7] sm:$0xf] %vm112_vm2, %v111_v11 }
  0xf7   :  { %207 = shalt.err (!%p204_p0)
}
  0xf8   :  { %123 = dma.vmem_to_hbm [thread:$0]  %s121_s25, 64, %s264_s3, [#allocation4]  }
  0xf9   :  { %220 = dma.done.wait [#allocation4], 64  }
  0xfa   :  { %221 = vsyncadd [#allocation4], 4294967232 }
  0xfb   :  { %127 = vsyncpa [#allocation3], 1 }
  0xfc   :  { %128 = vsyncpa [#allocation6], 1 }
  0xfd   :  { %129 = vsyncpa [#allocation4], 1 }

</bundles_post_ra>
